<compile_context>
chip_gen: v7x
topology: tpu7x:2x2x1
jax: 0.10.0
libtpu: 0.0.40
codegen_flags: <defaults>
</compile_context>

<pallas_src>
import jax
import jax.numpy as jnp
from jax.experimental import pallas as pl
from jax.experimental.pallas import tpu as pltpu


def _round_up(x, m):
    return (x + m - 1) // m * m


def _cdiv(a, b):
    return (a + b - 1) // b


def _tpu_info():
    """Best-effort (capacity_bytes, multi_tensorcore) query; safe fallbacks."""
    vmem_capacity = 128 * 1024 * 1024  # v5e / v6e physical VMEM per TC
    multi_core = False
    try:
        info = pltpu.get_tpu_info()
        vmem_capacity = int(getattr(info, "vmem_capacity_bytes", vmem_capacity))
        # v7x exposes 2 TensorCores per chip; detect via core-count attributes
        # or the chip-version name, defaulting to single-core if unknown.
        for attr in ("num_tensorcores", "tensorcore_count",
                     "num_tensorcores_per_chip", "cores_per_chip"):
            v = getattr(info, attr, None)
            if isinstance(v, int) and v >= 2:
                multi_core = True
                break
        if not multi_core:
            ver = getattr(info, "chip_version", None)
            if ver is not None and "7" in str(getattr(ver, "name", ver)):
                multi_core = True
    except Exception:
        pass
    return vmem_capacity, multi_core


def _mlp_nchw_kernel(x_ref, w_ref, b_ref, o_ref):
    # x_ref: (1, C_in, T)   w_ref: (C_out, C_in)   b_ref: (C_out, 1)
    # o_ref: (1, C_out, T).  f32 accumulation on the MXU regardless of the
    # streamed dtype.
    acc = jnp.dot(w_ref[...], x_ref[0], preferred_element_type=jnp.float32)
    o_ref[0] = (acc + b_ref[...]).astype(o_ref.dtype)


def mlp_nchw_linear(x, weight, bias, *, compute_dtype=None, out_dtype=None,
                    max_tile_hw=None, force_pallas=False):
    """Channel-mixing linear on an NCHW-flattened tensor.

    x:      (B, C_in, HW)
    weight: (C_out, C_in)   -- torch nn.Linear.weight layout
    bias:   (C_out,)
    compute_dtype: optional streaming dtype (e.g. jnp.bfloat16); accumulation
                   stays f32.  Note this also downcasts the weight, so results
                   differ slightly from an f32 torch Linear.
    out_dtype: output dtype (defaults to x's original dtype).
    """
    B, C_in, HW = x.shape
    C_out = weight.shape[0]
    if out_dtype is None:
        out_dtype = x.dtype

    if compute_dtype is not None:
        x = x.astype(compute_dtype)
        weight = weight.astype(compute_dtype)
    else:
        weight = weight.astype(x.dtype)

    in_item = jnp.dtype(x.dtype).itemsize
    w_item = jnp.dtype(weight.dtype).itemsize
    out_item = jnp.dtype(out_dtype).itemsize

    # --- Tiny-problem fallback: Pallas fixed dispatch / per-step overhead
    # dominates below ~1 MiB of total traffic; a fused XLA einsum wins there.
    total_bytes = (B * C_in * HW * in_item + B * C_out * HW * out_item
                   + C_out * C_in * w_item)
    if (not force_pallas) and total_bytes < (1 << 20):
        y = jnp.einsum("bci,oc->boi", x, weight,
                       preferred_element_type=jnp.float32)
        return (y + bias.astype(jnp.float32)[None, :, None]).astype(out_dtype)

    # --- Generation-aware VMEM budgeting -------------------------------------
    vmem_capacity, multi_core = _tpu_info()
    # Leave ~25% physical headroom and never request more than 64 MiB scoped
    # VMEM: 64 MiB on v5e/v6e (128 MiB physical), 48 MiB on v7x (64 MiB).
    vmem_limit = int(min((vmem_capacity * 3) // 4, 64 * 1024 * 1024))

    # Resident operands (constant index_map -> fetched once); assume the
    # runtime still double-buffers them to be conservative.
    resident_bytes = 2 * (C_out * C_in * w_item + C_out * 4)
    headroom = 2 * 1024 * 1024
    stream_budget = min(16 * 1024 * 1024, vmem_limit - resident_bytes - headroom)
    stream_budget = max(stream_budget, 1 * 1024 * 1024)

    # Bytes of streamed x + y per lane column, double-buffered.
    bytes_per_col = 2 * (C_in * in_item + C_out * out_item)
    cap = max(128, (stream_budget // bytes_per_col) // 128 * 128)
    if max_tile_hw is not None:
        cap = max(128, min(cap, _round_up(max_tile_hw, 128)))

    # --- Balanced lane tiles (avoid padding HW by up to a whole huge tile) ---
    hw_lane = _round_up(HW, 128)
    n_tiles = _cdiv(hw_lane, cap)
    tile_hw = _round_up(_cdiv(hw_lane, n_tiles), 128)
    hw_pad = n_tiles * tile_hw
    if hw_pad != HW:
        # Ragged spatial extent: zero-pad the lane axis (padded lanes are
        # sliced off after the call).
        x = jnp.pad(x, ((0, 0), (0, 0), (0, hw_pad - HW)))

    bias2d = bias.reshape(C_out, 1).astype(jnp.float32)

    # --- Streamed-activation BlockSpec, optionally 3-deep pipelined ----------
    # When large C forces small HW tiles, per-tile compute is too small to hide
    # DMA latency; a third buffer helps for a few hundred KB of extra VMEM.
    x_spec = pl.BlockSpec((1, C_in, tile_hw), lambda b, j: (b, 0, j))
    extra_buf_bytes = C_in * tile_hw * in_item
    want_deep_pipeline = (
        tile_hw <= 2048
        and n_tiles >= 4
        and (stream_budget - bytes_per_col * tile_hw) >= extra_buf_bytes
    )
    if want_deep_pipeline:
        try:
            x_spec = pl.BlockSpec((1, C_in, tile_hw), lambda b, j: (b, 0, j),
                                  pipeline_mode=pl.Buffered(3))
        except (AttributeError, TypeError):
            pass  # older API: keep default double-buffering

    # --- Megacore sharding: real 2-TC split on v7x via CORE_PARALLEL ---------
    core_parallel = getattr(pltpu, "CORE_PARALLEL", None)
    parallel = getattr(pltpu, "PARALLEL", "parallel")
    if multi_core and core_parallel is not None:
        dim_sems = (parallel, core_parallel)     # split HW tiles across TCs
    else:
        dim_sems = ("parallel", "parallel")      # no-op on 1-TC v5e/v6e

    grid = (B, n_tiles)
    y = pl.pallas_call(
        _mlp_nchw_kernel,
        out_shape=jax.ShapeDtypeStruct((B, C_out, hw_pad), out_dtype),
        grid=grid,
        in_specs=[
            x_spec,
            # Weight and bias: constant index_map -> VMEM-resident across grid.
            pl.BlockSpec((C_out, C_in), lambda b, j: (0, 0)),
            pl.BlockSpec((C_out, 1), lambda b, j: (0, 0)),
        ],
        out_specs=pl.BlockSpec((1, C_out, tile_hw), lambda b, j: (b, 0, j)),
        compiler_params=pltpu.CompilerParams(
            dimension_semantics=dim_sems,
            vmem_limit_bytes=vmem_limit,
        ),
    )(x, weight, bias2d)

    if hw_pad != HW:
        y = y[:, :, :HW]
    return y


def segformer_mlp_forward(x_nchw, weight, bias, *, compute_dtype=None,
                          out_dtype=None, max_tile_hw=None, force_pallas=False):
    """Equivalent of the PyTorch MLP.forward.

    x_nchw: (B, C_in, H, W);  weight: (C_out, C_in);  bias: (C_out,)
    returns (B, C_out, H, W)
    """
    B, C_in, H, W = x_nchw.shape
    C_out = weight.shape[0]
    x_chw = x_nchw.reshape(B, C_in, H * W)        # free reshape (contiguous)
    y = mlp_nchw_linear(x_chw, weight, bias, compute_dtype=compute_dtype,
                        out_dtype=out_dtype, max_tile_hw=max_tile_hw,
                        force_pallas=force_pallas)
    return y.reshape(B, C_out, H, W)              # free reshape (contiguous)


if __name__ == "__main__":
    # Module config: skip_channels -> segmentation_channels linear layer.
    skip_channels = 4
    segmentation_channels = 32
    B, H, W = 2, 16, 16

    key = jax.random.PRNGKey(0)
    kx, kw, kb = jax.random.split(key, 3)

    x = jax.random.normal(kx, (B, skip_channels, H, W), dtype=jnp.float32)
    bound = 1.0 / (skip_channels ** 0.5)
    weight = jax.random.uniform(
        kw, (segmentation_channels, skip_channels), jnp.float32, -bound, bound
    )
    bias = jax.random.uniform(
        kb, (segmentation_channels,), jnp.float32, -bound, bound
    )

    ref = jnp.einsum("bchw,oc->bohw", x, weight) + bias[None, :, None, None]

    # 1) Auto path: this toy size (~72 KB) takes the fused-einsum fallback.
    out_auto = segformer_mlp_forward(x, weight, bias)
    jax.block_until_ready(out_auto)
    assert out_auto.shape == (B, segmentation_channels, H, W)
    assert jnp.allclose(out_auto, ref, atol=1e-5, rtol=1e-5)

    # 2) Forced Pallas path, f32 streaming (tight tolerance).
    out_pallas = segformer_mlp_forward(x, weight, bias, force_pallas=True)
    jax.block_until_ready(out_pallas)
    assert out_pallas.shape == (B, segmentation_channels, H, W)
    assert jnp.allclose(out_pallas, ref, atol=1e-5, rtol=1e-5)

    # 3) Forced Pallas path, bf16 streaming + bf16 output, f32 accumulation.
    out_bf16 = segformer_mlp_forward(
        x, weight, bias, compute_dtype=jnp.bfloat16, out_dtype=jnp.bfloat16,
        force_pallas=True)
    jax.block_until_ready(out_bf16)
    assert out_bf16.dtype == jnp.bfloat16
    assert jnp.allclose(out_bf16.astype(jnp.float32), ref, atol=6e-2, rtol=6e-2)

    # 4) Larger ragged spatial extent: exercises balanced multi-tile grid and
    #    the lane-padding / slice-off path (3 balanced tiles of 576 lanes).
    H2 = W2 = 40
    x2 = jax.random.normal(jax.random.PRNGKey(1), (B, skip_channels, H2, W2),
                           dtype=jnp.float32)
    ref2 = jnp.einsum("bchw,oc->bohw", x2, weight) + bias[None, :, None, None]
    out2 = segformer_mlp_forward(x2, weight, bias, max_tile_hw=640,
                                 force_pallas=True)
    jax.block_until_ready(out2)
    assert out2.shape == (B, segmentation_channels, H2, W2)
    assert jnp.allclose(out2, ref2, atol=1e-5, rtol=1e-5)

    print("KERNEL_OK")
</pallas_src>

<mosaic_0001>
module attributes {stable_mosaic.version = 11 : i64} {
  func.func @_mlp_nchw_kernel(%arg0: i32, %arg1: i32, %arg2: memref<1x4x256xf32, #tpu.memory_space<vmem>>, %arg3: memref<32x4xf32, #tpu.memory_space<vmem>>, %arg4: memref<32x1xf32, #tpu.memory_space<vmem>>, %arg5: memref<1x32x256xf32, #tpu.memory_space<vmem>>) attributes {dimension_semantics = [#tpu.dimension_semantics<parallel>, #tpu.dimension_semantics<parallel>], iteration_bounds = array<i64: 2, 1>, scalar_prefetch = 0 : i64, scratch_operands = 0 : i64, tpu.core_type = #tpu.core_type<tc>, window_params = [{transform_indices = @transform_0, window_bounds = array<i64: 1, 4, 256>}, {pipeline_mode = #tpu.pipeline_mode<synchronous>, transform_indices = @transform_1, window_bounds = array<i64: 32, 4>}, {pipeline_mode = #tpu.pipeline_mode<synchronous>, transform_indices = @transform_2, window_bounds = array<i64: 32, 1>}, {transform_indices = @transform_3, window_bounds = array<i64: 1, 32, 256>}]} {
    %c0 = arith.constant 0 : index
    %c0_0 = arith.constant 0 : index
    %0 = vector.load %arg3[%c0, %c0_0] : memref<32x4xf32, #tpu.memory_space<vmem>>, vector<32x4xf32>
    %c0_1 = arith.constant 0 : index
    %c0_2 = arith.constant 0 : index
    %c0_3 = arith.constant 0 : index
    %1 = vector.load %arg2[%c0_1, %c0_2, %c0_3] : memref<1x4x256xf32, #tpu.memory_space<vmem>>, vector<1x4x256xf32>
    %2 = vector.shape_cast %1 : vector<1x4x256xf32> to vector<4x256xf32>
    %cst = arith.constant dense<0.000000e+00> : vector<32x256xf32>
    %3 = tpu.matmul %0, %2, %cst {dimension_numbers = #tpu.dot_dimension_numbers<[1], [0], [0], [1], [0, 0, 1, 1], [], []>} : vector<32x4xf32>, vector<4x256xf32>, vector<32x256xf32> -> vector<32x256xf32>
    %c0_4 = arith.constant 0 : index
    %c0_5 = arith.constant 0 : index
    %4 = vector.load %arg4[%c0_4, %c0_5] : memref<32x1xf32, #tpu.memory_space<vmem>>, vector<32x1xf32>
    %5 = vector.broadcast %4 : vector<32x1xf32> to vector<32x256xf32>
    %6 = arith.addf %3, %5 : vector<32x256xf32>
    %c0_6 = arith.constant 0 : index
    %c0_7 = arith.constant 0 : index
    %c0_8 = arith.constant 0 : index
    %7 = vector.load %arg5[%c0_6, %c0_7, %c0_8] : memref<1x32x256xf32, #tpu.memory_space<vmem>>, vector<1x32x256xf32>
    %8 = vector.shape_cast %7 : vector<1x32x256xf32> to vector<32x256xf32>
    %9 = vector.shape_cast %6 : vector<32x256xf32> to vector<1x32x256xf32>
    tpu.vector_store %arg5[%c0_6, %c0_7, %c0_8], %9 {strides = array<i32>} : memref<1x32x256xf32, #tpu.memory_space<vmem>>, vector<1x32x256xf32>,
    return
  }
  func.func @transform_0(%arg0: i32, %arg1: i32) -> (i32, i32, i32) {
    %c0_i32 = arith.constant 0 : i32
    %c0_i32_0 = arith.constant 0 : i32
    return %arg0, %c0_i32, %arg1 : i32, i32, i32
  }
  func.func @transform_1(%arg0: i32, %arg1: i32) -> (i32, i32) {
    %c0_i32 = arith.constant 0 : i32
    %c0_i32_0 = arith.constant 0 : i32
    %c0_i32_1 = arith.constant 0 : i32
    return %c0_i32, %c0_i32_0 : i32, i32
  }
  func.func @transform_2(%arg0: i32, %arg1: i32) -> (i32, i32) {
    %c0_i32 = arith.constant 0 : i32
    %c0_i32_0 = arith.constant 0 : i32
    %c0_i32_1 = arith.constant 0 : i32
    return %c0_i32, %c0_i32_0 : i32, i32
  }
  func.func @transform_3(%arg0: i32, %arg1: i32) -> (i32, i32, i32) {
    %c0_i32 = arith.constant 0 : i32
    %c0_i32_0 = arith.constant 0 : i32
    return %arg0, %c0_i32, %arg1 : i32, i32, i32
  }
}

</mosaic_0001>

<bundles_post_ra>
// kernel: tpu_custom_call.1
= control target key start
LH: loop header
LB: loop body
LE: loop exit
PB: predicated region body
PF: predicated region fallthrough
CT: control target
= control target key end

     0   :  { %8 = vsyncpa [#allocation3], 0  ;;  %s1086_s0 = inlined_call_operand.hbm [shape: f32[2,4,256], index: 0, kind: input, shape index: {}]   ;;  %s1087_s1 = inlined_call_operand.hbm [shape: f32[32,4], index: 1, kind: input, shape index: {}]   ;;  %s1088_s2 = inlined_call_operand.hbm [shape: f32[32,1], index: 2, kind: input, shape index: {}]   ;;  %s1089_s3 = inlined_call_operand.hbm [shape: f32[2,32,256], index: 3, kind: output, shape index: {}]  }
   0x1   :  { %10 = vsyncpa [#allocation3 + $0x1], 0 }
   0x2   :  { %11 = vsyncpa [#allocation6], 0 }
   0x3   :  { %12 = vsyncpa [#allocation4], 0 }
   0x4   :  { %14 = vsyncpa [#allocation4 + $0x1], 0  ;;  %s829_s12 = smov 0   ;;  %s831_s13 = smov 0  }
   0x5   :  { %s833_s14 = smov 0   ;;  %s835_s15 = smov 0  }
   0x6   :  { %s837_s16 = smov 0   ;;  %s839_s17 = smov 0  }
   0x7 LB: > { %s504_s18 = sadd.s32 4294967295, %s797_s17   ;;  %s505_s19 = sadd.s32 4294967294, %s797_s17   ;;  %s797_s17 = sphi %s839_s17, %s20_s17   ;;  %s793_s16 = sphi %s837_s16, %s1111_s16   ;;  %s789_s15 = sphi %s835_s15, %s1110_s15   ;;  %s785_s14 = sphi %s833_s14, %s1109_s14   ;;  %s781_s13 = sphi %s831_s13, %s1108_s13   ;;  %s777_s12 = sphi %s829_s12, %s1107_s12  }
   0x8   : > { %p54_p0 = scmp.ne.s32.totalorder %s781_s13, %s777_s12  ;;  %p863_p1 = scmp.eq.s32.totalorder %s504_s18, 0 }
   0x9   : > { %p867_p2 = scmp.eq.s32.totalorder %s504_s18, 1  ;;  %p128_p3 = scmp.eq.s32.totalorder %s505_s19, 1 }
   0xa   : > { %s1094_s20 = scalar_select %p863_p1, 1, 0 }
   0xb   : > { %p873_p4 = por %p863_p1, %p54_p0  ;;  %p506_p5 = scmp.ge.s32.totalorder %s797_s17, 1 }
   0xc   : > { %p878_p6 = por %p128_p3, %p54_p0  ;;  %p135_p7 = scmp.lt.s32.totalorder %s797_s17, 3 }
   0xd   : > { %s1096_s22 = scalar_select %p873_p4, 1, 0 }
   0xe   : > { %s1097_s23 = scalar_select %p878_p6, 1, 0 }
   0xf   : > { %p883_p8 = pnand %p506_p5, %p135_p7  ;;  %s799_s25 = smov [#allocation5]  }
  0x10   : > { %s147_s26 = sshll.u32 %s799_s25, 4  ;;  %s800_s28 = smov [#allocation7]   ;;  %s887_s26 = int_to_ptr.vmem [resolvable:$true] %s147_s26 }
  0x11   : > { %p545_p9 = pneg %p883_p8  ;;  %s160_s29 = sshll.u32 %s800_s28, 4  ;;  %s898_s29 = int_to_ptr.vmem [resolvable:$true] %s160_s29 }
  0x12   : > { %s625_s5 = scalar_lea.hbm %s1087_s1, 512 }
  0x13   : > { %p894_p11 = pnand %p545_p9, %p863_p1  ;;  %p626_p12 = scmp.ne.s32.totalorder %s1087_s1, %s625_s5 }
  0x14   : > { %p632_p5 = scmp.lt.u32.totalorder %s625_s5, %s1087_s1 }
  0x15   : > { %p627_p13 = pneg %p894_p11 }
  0x17   : > { %p628_p0 = pnand %p627_p13, %p626_p12 }
  0x19   : > { %p629_p3 = pneg %p628_p0 }
  0x1b   : > { %p634_p7 = pnand %p632_p5, %p629_p3 }
  0x1d   : > { %637 = shalt.err (!%p634_p7)
}
  0x1e   : > { %s638_s10 = scalar_lea.vmem %s887_s26, 512  ;;  %p646_p1 = scmp.lt.s32.totalorder %s887_s26, %s887_s26 }
  0x1f   : > { %p639_p9 = scmp.ne.s32.totalorder %s887_s26, %s638_s10  ;;  %p647_p12 = scmp.lt.s32.totalorder %s638_s10, %s638_s10 }
  0x21   : > { %p641_p10 = pnand %p639_p9, %p627_p13  ;;  %p648_p0 = por %p647_p12, %p646_p1 }
  0x23   : > { %p642_p6 = pneg %p641_p10 }
  0x25   : > { %p649_p4 = pnand %p648_p0, %p642_p6 }
  0x27   : > { %652 = shalt.err (!%p649_p4)
}
  0x28   : > { %s801_s11 = smov 128   ;;  %s802_s18 = smov 8  }
  0x29   : > { %548 = dma.hbm_to_vmem [thread:$0]  (!%p894_p11), %s1087_s1, 512, %s887_s26, [#allocation6], %s801_s11, %s801_s11, %s802_s18  }
  0x2a   : > { %s653_s4 = scalar_lea.hbm %s1088_s2, 512 }
  0x2b   : > { %p654_p1 = scmp.ne.s32.totalorder %s1088_s2, %s653_s4  ;;  %p660_p10 = scmp.lt.u32.totalorder %s653_s4, %s1088_s2 }
  0x2d   : > { %p656_p4 = pnand %p654_p1, %p627_p13 }
  0x2f   : > { %p657_p6 = pneg %p656_p4 }
  0x31   : > { %p662_p3 = pnand %p660_p10, %p657_p6 }
  0x33   : > { %665 = shalt.err (!%p662_p3)
}
  0x34   : > { %s666_s26 = scalar_lea.vmem %s898_s29, 512  ;;  %p674_p12 = scmp.lt.s32.totalorder %s898_s29, %s898_s29 }
  0x35   : > { %p667_p5 = scmp.ne.s32.totalorder %s898_s29, %s666_s26  ;;  %p675_p0 = scmp.lt.s32.totalorder %s666_s26, %s666_s26 }
  0x37   : > { %p669_p7 = pnand %p667_p5, %p627_p13  ;;  %p676_p1 = por %p675_p0, %p674_p12 }
  0x39   : > { %p670_p9 = pneg %p669_p7 }
  0x3b   : > { %p677_p4 = pnand %p676_p1, %p670_p9 }
  0x3d   : > { %680 = shalt.err (!%p677_p4)
}
  0x3e   : > { %551 = dma.hbm_to_vmem [thread:$0]  (!%p894_p11), %s1088_s2, 512, %s898_s29, [#allocation6], %s801_s11, %s801_s11, %s802_s18  }
  0x3f   : > { %s32_s19 = sadd.s32 1, %s793_s16  ;;  %s41_s25 = sadd.s32 1, %s785_s14 }
  0x40   : > { %p34_p13 = scmp.ge.s32.totalorder %s32_s19, 2  ;;  %p48_p6 = scmp.ne.s32.totalorder %s785_s14, %s781_s13 }
  0x41   : > { %p49_p10 = scmp.eq.s32.totalorder %s797_s17, 0  ;;  %p562_p3 = scmp.lt.s32.totalorder %s797_s17, 2 }
  0x42   : > { %s1113_s19 = smov (%p34_p13, %s32_s19), 0  ;;  %p962_p7 = por %p867_p2, %p48_p6 }
  0x43   : > { %p50_p5 = por %p49_p10, %p48_p6  ;;  %s36_s28 = ssub.s32 %s793_s16, %s1113_s19 }
  0x44   : > { %s1100_s27 = scalar_select %p962_p7, 1, 0 }
  0x45   : > { %s174_s30 = sand.u32 1, %s785_s14   ;;  %p39_p9 = scmp.eq.s32.totalorder %s36_s28, 0 }
  0x46   : > { %s510_s29 = sshll.u32 %s174_s30, 3  ;;  %s529_s11 = sshll.u32 %s793_s16, 7 }
  0x47   : > { %s971_s18 = scalar_select %p39_p9, %s785_s14, %s41_s25  }
  0x48   : > { %s976_s6 = scalar_lea.hbm %s1086_s0, %s529_s11  ;;  %s178_s21 = scalar_lea.vmem [#allocation2], %s510_s29 }
  0x49   : > { %s188_s7 = sshll.u32 %s178_s21, 4  ;;  %p980_p2 = pnand %p562_p3, %p50_p5  ;;  %s984_s7 = int_to_ptr.vmem [resolvable:$true] %s188_s7 }
  0x4a   : > { %s175_s26 = scalar_lea.sflag [#allocation3], %s174_s30  ;;  %s681_s9 = scalar_lea.hbm %s976_s6, 128 }
  0x4b   : > { %p682_p11 = scmp.ne.s32.totalorder %s976_s6, %s681_s9  ;;  %p683_p12 = pneg %p980_p2 }
  0x4c   : > { %s686_s28 = scalar_lea.hbm %s1086_s0, 256  ;;  %p687_p4 = scmp.lt.u32.totalorder %s976_s6, %s1086_s0 }
  0x4d   : > { %p684_p0 = pnand %p683_p12, %p682_p11  ;;  %p688_p13 = scmp.lt.u32.totalorder %s686_s28, %s681_s9 }
  0x4e   : > { %p690_p10 = scmp.lt.u32.totalorder %s681_s9, %s976_s6 }
  0x4f   : > { %p685_p1 = pneg %p684_p0  ;;  %p689_p6 = por %p688_p13, %p687_p4 }
  0x51   : > { %p691_p3 = por %p690_p10, %p689_p6 }
  0x53   : > { %p692_p5 = pnand %p691_p3, %p685_p1 }
  0x55   : > { %695 = shalt.err (!%p692_p5)
}
  0x56   : > { %s696_s30 = scalar_lea.vmem %s984_s7, 128  ;;  %s803_s4 = smov [#allocation2]  }
  0x57   : > { %p697_p9 = scmp.ne.s32.totalorder %s984_s7, %s696_s30  ;;  %s701_s5 = sshll.u32 %s803_s4, 4  ;;  %s702_s5 = int_to_ptr.vmem [resolvable:$false] %s701_s5 }
  0x58   : > { %s703_s21 = scalar_lea.vmem %s702_s5, 256  ;;  %p704_p7 = scmp.lt.s32.totalorder %s984_s7, %s702_s5 }
  0x59   : > { %p699_p11 = pnand %p697_p9, %p683_p12  ;;  %p705_p4 = scmp.lt.s32.totalorder %s703_s21, %s696_s30 }
  0x5b   : > { %p700_p0 = pneg %p699_p11  ;;  %p706_p13 = por %p705_p4, %p704_p7 }
  0x5d   : > { %p707_p6 = pnand %p706_p13, %p700_p0 }
  0x5f   : > { %710 = shalt.err (!%p707_p6)
}
  0x60   : > { %555 = dma.hbm_to_vmem [thread:$0]  (!%p980_p2), %s976_s6, 128, %s984_s7, %s175_s26  }
  0x61   : > { %197 = sbr.rel (%p883_p8) target bundleno = 348 (0x15c), region = 32  ;;  %s1014_s9 = sand.u32 (!%p883_p8), 1, %s781_s13  }
  0x62   : > { %s514_s10 = sshll.u32 (!%p883_p8), %s1014_s9, 3  ;;  %s200_s25 = scalar_lea.sflag (!%p883_p8), [#allocation3], %s1014_s9 }
  0x63   : > { %s203_s28 = scalar_lea.vmem (!%p883_p8), [#allocation2], %s514_s10  ;;  %p1102_p7 = scmp.ne.s32.totalorder (!%p883_p8), %s1096_s22, 0 }
  0x68   : > { %764 = dma.done.wait (%p1102_p7), %s200_s25, 128  }
  0x69   : > { %766 = vsyncadd (%p1102_p7), %s200_s25, 4294967168  ;;  %p1103_p12 = scmp.ne.s32.totalorder %s1094_s20, 0 }
  0x6b   : > { %768 = dma.done.wait (%p1103_p12), [#allocation6], 1024  }
  0x6c   : > { %770 = vsyncadd (%p1103_p12), [#allocation6], 4294966272  ;;  %v804_v0 = vmov 0.0   ;;  %v805_v1 = vmov 0   ;;  %v240_v2 = vld [vmem:[%s203_s28] sm:$0xff]  ;;  %vm280_vm0 = vcmask 1043456  }
  0x6d   : > { %349 = vmatprep.mubr.f32.mxu0 %v804_v0  ;;  %361 = vmatprep.mubr.f32.mxu1 %v804_v0  ;;  %v266_v3 = vcombine.high %v240_v2, %v240_v2  ;;  %v243_v4 = vld [vmem:[#allocation7 + $0x10] sm:$0xff]  ;;  %v236_v5 = vld [vmem:[#allocation5] sm:$0xff]  ;;  %vm267_vm1 = vcmask 31744   ;;  %v244_v8 = vld [vmem:[#allocation7 + $0x18] sm:$0xff]  ;;  %s517_s20 = sshll.u32 %s1014_s9, 6  ;;  %s530_s6 = sshll.u32 %s789_s15, 10 }
  0x6e   : > { %623 = vset.pattern.permute.xlu1 %v805_v1  ;;  %622 = vset.pattern.permute.xlu0 %v805_v1  ;;  %v238_v6 = vld [vmem:[#allocation5 + $0x10] sm:$0xff]  ;;  %v241_v7 = vld [vmem:[#allocation7] sm:$0xff]  ;;  %v237_v9 = vld [vmem:[#allocation5 + $0x8] sm:$0xff]  ;;  %s233_s22 = scalar_lea.vmem [#allocation8], %s517_s20  ;;  %s1037_s8 = scalar_lea.hbm %s1089_s3, %s530_s6 }
  0x6f   : > { %257 = vperm.xlu1 %623, %v243_v4   ;;  %518 = vmatprep.subr.msk.mxu0 %vm280_vm0, %v266_v3  ;;  %v239_v10 = vld [vmem:[#allocation5 + $0x18] sm:$0xff]  ;;  %v242_v11 = vld [vmem:[#allocation7 + $0x8] sm:$0xff]  ;;  %s398_s24 = sshll.u32 %s233_s22, 4  ;;  %s383_s26 = scalar_lea.sflag [#allocation4], %s1014_s9  ;;  %s1032_s24 = int_to_ptr.vmem [resolvable:$true] %s398_s24 }
  0x70   : > { %531 = vmatprep.subr.msk.mxu1 %vm280_vm0, %v266_v3  ;;  %519 = vmatpush1.msk.msra.mxu0 %vm280_vm0, %v240_v2  ;;  %s711_s29 = scalar_lea.vmem %s1032_s24, 1024  ;;  %p1104_p2 = scmp.ne.s32.totalorder %s1100_s27, 0 }
  0x71   : > { %532 = vmatpush1.msk.msra.mxu1 %vm280_vm0, %v240_v2  ;;  %520 = vmatmul.mubr.msk.f32.vlgmr.msra.gmra.mrb[0].mxu0 %vm267_vm1, %v236_v5  ;;  %p712_p8 = scmp.ne.s32.totalorder %s1032_s24, %s711_s29  ;;  %s806_s11 = smov [#allocation8]  }
  0x72   : > { %522 = vmatmul.mubr.msk.f32.vlgmr.msra.gmra.mrb[0].mxu1 %vm267_vm1, %v238_v6  ;;  %355 = vmatprep.mubr.f32.mxu0 %v804_v0  ;;  %s715_s30 = sshll.u32 %s806_s11, 4  ;;  %s716_s30 = int_to_ptr.vmem [resolvable:$false] %s715_s30 }
  0x73   : > { %367 = vmatprep.mubr.f32.mxu1 %v804_v0  ;;  %247 = vperm.xlu0 %622, %v241_v7   ;;  %p713_p1 = pnand %p712_p8, %p1104_p2  ;;  %s717_s4 = scalar_lea.vmem %s716_s30, 2048 }
  0x74   : > { %262 = vperm.xlu1 %623, %v244_v8   ;;  %p718_p3 = scmp.lt.s32.totalorder %s1032_s24, %s716_s30  ;;  %p719_p5 = scmp.lt.s32.totalorder %s717_s4, %s711_s29 }
  0x75   : > { %521 = vmatmul.mubr.msk.f32.gmra.mrb[2].mxu0 %vm267_vm1, %v237_v9  ;;  %p714_p10 = pneg %p713_p1 }
  0x76   : > { %523 = vmatmul.mubr.msk.f32.gmra.mrb[2].mxu1 %vm267_vm1, %v239_v10  ;;  %p720_p9 = por %p719_p5, %p718_p3 }
  0x77   : > { %252 = vperm.xlu0 %622, %v242_v11  }
  0x78   : > { %p721_p11 = pnand %p720_p9, %p714_p10 }
  0xee   : > { %v258_v12 = vpop.permute.xlu1 %257 }
  0xf2   : > { %v248_v13 = vpop.permute.xlu0 %247 }
  0xf3   : > { %v263_v22 = vpop.permute.xlu1 %262 }
  0xf6   : > { %v253_v23 = vpop.permute.xlu0 %252 }
 0x144   : > { %v351_v14 = vpop.f32.mrb[0].mxu0 }
 0x145   : > { %v363_v15 = vpop.f32.mrb[0].mxu1  ;;  %v352_v16 = vadd.f32 %v351_v14, %v248_v13  ;;  %v353_v18 = vpop.f32.mrb[1].mxu0 }
 0x146   : > { %v364_v17 = vadd.f32 %v363_v15, %v258_v12  ;;  %v365_v19 = vpop.f32.mrb[1].mxu1  ;;  %v354_v20 = vadd.f32 %v353_v18, %v248_v13 }
 0x147   : > { %v366_v21 = vadd.f32 %v365_v19, %v258_v12  ;;  %374 = vst [vmem:[%s233_s22] sm:$0xff] %v352_v16 }
 0x148   : > { %378 = vst [vmem:[%s233_s22 + $0x20] sm:$0xff] %v364_v17  ;;  %375 = vst [vmem:[%s233_s22 + $0x8] sm:$0xff] %v354_v20  ;;  %v357_v24 = vpop.f32.mrb[2].mxu0 }
 0x149   : > { %379 = vst [vmem:[%s233_s22 + $0x28] sm:$0xff] %v366_v21  ;;  %v369_v25 = vpop.f32.mrb[2].mxu1  ;;  %v358_v26 = vadd.f32 %v357_v24, %v253_v23  ;;  %v359_v28 = vpop.f32.mrb[3].mxu0 }
 0x14a   : > { %v370_v27 = vadd.f32 %v369_v25, %v263_v22  ;;  %v371_v29 = vpop.f32.mrb[3].mxu1  ;;  %v360_v30 = vadd.f32 %v359_v28, %v253_v23 }
 0x14b   : > { %v372_v31 = vadd.f32 %v371_v29, %v263_v22  ;;  %376 = vst [vmem:[%s233_s22 + $0x10] sm:$0xff] %v358_v26 }
 0x14c   : > { %380 = vst [vmem:[%s233_s22 + $0x30] sm:$0xff] %v370_v27  ;;  %377 = vst [vmem:[%s233_s22 + $0x18] sm:$0xff] %v360_v30 }
 0x14d   : > { %381 = vst [vmem:[%s233_s22 + $0x38] sm:$0xff] %v372_v31 }
 0x14e   : > { %724 = shalt.err (!%p721_p11)
}
 0x14f   : > { %s725_s5 = scalar_lea.hbm %s1037_s8, 1024  ;;  %s729_s25 = scalar_lea.hbm %s1089_s3, 2048 }
 0x150   : > { %p726_p0 = scmp.ne.s32.totalorder %s1037_s8, %s725_s5  ;;  %p730_p6 = scmp.lt.u32.totalorder %s1037_s8, %s1089_s3 }
 0x151   : > { %p731_p7 = scmp.lt.u32.totalorder %s729_s25, %s725_s5  ;;  %p733_p8 = scmp.lt.u32.totalorder %s725_s5, %s1037_s8 }
 0x152   : > { %p727_p4 = pnand %p726_p0, %p1104_p2 }
 0x153   : > { %p732_p12 = por %p731_p7, %p730_p6 }
 0x154   : > { %p728_p13 = pneg %p727_p4 }
 0x155   : > { %p734_p1 = por %p733_p8, %p732_p12 }
 0x157   : > { %p735_p10 = pnand %p734_p1, %p728_p13 }
 0x159   : > { %738 = shalt.err (!%p735_p10)
}
 0x15a   : > { %s807_s22 = smov 256   ;;  %s808_s6 = smov 16  }
 0x15b   : > { %543 = dma.vmem_to_hbm [thread:$0]  (%p1104_p2), %s1032_s24, 1024, %s1037_s8, %s383_s26, %s807_s22, %s807_s22, %s808_s6  }
 0x15c PF: > { %s413_s7 = sand.u32 1, %s777_s12   ;;  %p1105_p3 = scmp.ne.s32.totalorder %s1097_s23, 0 }
 0x15d   : > { %p1106_p5 = scmp.ge.s32.totalorder %s797_s17, 2  ;;  %s414_s15 = scalar_lea.sflag [#allocation4], %s413_s7 }
 0x15f   : > { %p557_p9 = pnand %p1106_p5, %p1105_p3 }
 0x161   : > { %772 = dma.done.wait (!%p557_p9), %s414_s15, 1024  }
 0x162   : > { %774 = vsyncadd (!%p557_p9), %s414_s15, 4294966272  ;;  %s20_s17 = sadd.s32 1, %s797_s17   ;;  %s1107_s12 = smov %s781_s13 }
 0x163   : > { %p17_p11 = scmp.ge.s32.totalorder %s20_s17, 4   ;;  %s1108_s13 = smov %s785_s14 }
 0x164   : > { %s1109_s14 = smov %s971_s18  ;;  %s1110_s15 = smov %s793_s16 }
 0x165   : > { %s1111_s16 = smov %s1113_s19  ;;  %19 = sbr.rel (!%p17_p11) target bundleno = 7 (0x7), region = 85 }
 0x16c   :  { %419 = vsyncpa [#allocation3], 1 }
 0x16d   :  { %421 = vsyncpa [#allocation3 + $0x1], 1 }
 0x16e   :  { %422 = vsyncpa [#allocation6], 1 }
 0x16f   :  { %423 = vsyncpa [#allocation4], 1 }
 0x170   :  { %425 = vsyncpa [#allocation4 + $0x1], 1 }

</bundles_post_ra>
